<compile_context>
chip_gen: v7x
topology: tpu7x:2x2x1
jax: 0.10.0
libtpu: 0.0.40
codegen_flags: <defaults>
</compile_context>

<pallas_src>
import numpy as np

import jax
import jax.numpy as jnp
from jax.experimental import pallas as pl
from jax.experimental.pallas import tpu as pltpu

LANE = 128
MAX_TILE_ROWS = 512  # 512 x 128 f32 = 256 KiB per input block per pipeline buffer


def _fused_d_loss_kernel(gen_ref, real_ref, w_ref, out_ref, acc_ref):
    # Zero the persistent accumulators on the first grid step.
    @pl.when(pl.program_id(0) == 0)
    def _():
        acc_ref[...] = jnp.zeros_like(acc_ref)
        out_ref[...] = jnp.zeros_like(out_ref)

    g = gen_ref[...].astype(jnp.float32)
    r = real_ref[...].astype(jnp.float32)
    w = w_ref[...]  # (tile_rows, 1): 1/n_k on rows of pair k, 0 on padding rows

    # Elementwise accumulate; the final cross-lane/sublane reduce is deferred.
    acc_ref[...] += w * ((r - 1.0) * (r - 1.0) + g * g)

    @pl.when(pl.program_id(0) == pl.num_programs(0) - 1)
    def _():
        out_ref[...] += jnp.sum(acc_ref[...])


def _fused_pairs_loss(gen_list, real_list):
    """sum_k [ mean((real_k - 1)^2) + mean(gen_k^2) ] in one pallas_call."""
    assert len(gen_list) == len(real_list)
    if not gen_list:
        return jnp.float32(0.0)

    dtype = jnp.result_type(*(g.dtype for g in gen_list),
                            *(r.dtype for r in real_list))

    gen_parts, real_parts, w_parts = [], [], []
    total_rows = 0
    for g, r in zip(gen_list, real_list):
        assert g.shape == r.shape, "paired discriminator outputs must match"
        n = g.size
        rows = -(-n // LANE)               # ceil(n / 128)
        pad = rows * LANE - n
        # gen padded with 0 -> gen^2 adds 0; real padded with 1 -> (real-1)^2 adds 0.
        gen_parts.append(jnp.pad(g.reshape(-1).astype(dtype), (0, pad),
                                 constant_values=0))
        real_parts.append(jnp.pad(r.reshape(-1).astype(dtype), (0, pad),
                                  constant_values=1))
        w_parts.append(np.full((rows,), 1.0 / n, dtype=np.float32))
        total_rows += rows

    # Tile size: as large as useful, multiple of 8 sublanes, capped at 512 rows.
    tile_rows = min(MAX_TILE_ROWS, ((total_rows + 7) // 8) * 8)
    rows_padded = -(-total_rows // tile_rows) * tile_rows
    extra_rows = rows_padded - total_rows
    if extra_rows:
        gen_parts.append(jnp.zeros((extra_rows * LANE,), dtype))
        real_parts.append(jnp.ones((extra_rows * LANE,), dtype))
        w_parts.append(np.zeros((extra_rows,), np.float32))

    gen_cat = jnp.concatenate(gen_parts).reshape(rows_padded, LANE)
    real_cat = jnp.concatenate(real_parts).reshape(rows_padded, LANE)
    w = jnp.asarray(np.concatenate(w_parts).reshape(rows_padded, 1))

    grid = rows_padded // tile_rows
    n_elems = rows_padded * LANE
    itemsize = jnp.dtype(dtype).itemsize
    cost = pl.CostEstimate(
        flops=6 * n_elems,
        transcendentals=0,
        bytes_accessed=int(2 * n_elems * itemsize + rows_padded * 4 + 4),
    )

    out = pl.pallas_call(
        _fused_d_loss_kernel,
        out_shape=jax.ShapeDtypeStruct((1, 1), jnp.float32),
        grid=(grid,),
        in_specs=[
            pl.BlockSpec((tile_rows, LANE), lambda i: (i, 0)),
            pl.BlockSpec((tile_rows, LANE), lambda i: (i, 0)),
            pl.BlockSpec((tile_rows, 1), lambda i: (i, 0)),
        ],
        out_specs=pl.BlockSpec((1, 1), lambda i: (0, 0)),
        scratch_shapes=[pltpu.VMEM((tile_rows, LANE), jnp.float32)],
        compiler_params=pltpu.CompilerParams(
            dimension_semantics=("arbitrary",)),
        cost_estimate=cost,
    )(gen_cat, real_cat, w)

    return out[0, 0]


def discriminator_loss(pred_gen_mpd, pred_gen_msd, pred_real_mpd, pred_real_msd, **batch):
    # loss_D is a plain sum over MPD and MSD pairs -> fuse everything into one kernel.
    gen_all = list(pred_gen_mpd) + list(pred_gen_msd)
    real_all = list(pred_real_mpd) + list(pred_real_msd)
    return {"loss_D": _fused_pairs_loss(gen_all, real_all)}


def _reference(pred_gen_mpd, pred_gen_msd, pred_real_mpd, pred_real_msd):
    loss = 0.0
    for g, r in zip(pred_gen_mpd, pred_real_mpd):
        loss = loss + jnp.mean((r.astype(jnp.float32) - 1.0) ** 2) + jnp.mean(g.astype(jnp.float32) ** 2)
    for g, r in zip(pred_gen_msd, pred_real_msd):
        loss = loss + jnp.mean((r.astype(jnp.float32) - 1.0) ** 2) + jnp.mean(g.astype(jnp.float32) ** 2)
    return loss


if __name__ == "__main__":
    key = jax.random.PRNGKey(0)

    # Synthetic discriminator outputs (lists of per-sub-discriminator prediction maps).
    # MPD-like outputs: (batch, 1, frames, period); MSD-like outputs: (batch, 1, time).
    mpd_shapes = [(2, 1, 16, 2), (2, 1, 12, 3), (2, 1, 8, 5)]
    msd_shapes = [(2, 1, 64), (2, 1, 32)]

    keys = jax.random.split(key, 2 * (len(mpd_shapes) + len(msd_shapes)))
    ki = iter(keys)

    pred_gen_mpd = [jax.random.normal(next(ki), s, dtype=jnp.float32) for s in mpd_shapes]
    pred_real_mpd = [jax.random.normal(next(ki), s, dtype=jnp.float32) for s in mpd_shapes]
    pred_gen_msd = [jax.random.normal(next(ki), s, dtype=jnp.float32) for s in msd_shapes]
    pred_real_msd = [jax.random.normal(next(ki), s, dtype=jnp.float32) for s in msd_shapes]

    out = discriminator_loss(pred_gen_mpd, pred_gen_msd, pred_real_mpd, pred_real_msd)
    loss = jax.block_until_ready(out["loss_D"])

    ref = _reference(pred_gen_mpd, pred_gen_msd, pred_real_mpd, pred_real_msd)
    assert jnp.allclose(loss, ref, rtol=1e-5, atol=1e-5), (loss, ref)

    print("KERNEL_OK")
</pallas_src>

<mosaic_0001>
module attributes {stable_mosaic.version = 11 : i64} {
  func.func @_fused_d_loss_kernel(%arg0: i32, %arg1: memref<8x128xf32, #tpu.memory_space<vmem>>, %arg2: memref<8x128xf32, #tpu.memory_space<vmem>>, %arg3: memref<8x1xf32, #tpu.memory_space<vmem>>, %arg4: memref<1x1xf32, #tpu.memory_space<vmem>>, %arg5: memref<8x128xf32, #tpu.memory_space<vmem>>) attributes {dimension_semantics = [#tpu.dimension_semantics<arbitrary>], iteration_bounds = array<i64: 1>, scalar_prefetch = 0 : i64, scratch_operands = 1 : i64, tpu.core_type = #tpu.core_type<tc>, window_params = [{transform_indices = @transform_0, window_bounds = array<i64: 8, 128>}, {transform_indices = @transform_1, window_bounds = array<i64: 8, 128>}, {transform_indices = @transform_2, window_bounds = array<i64: 8, 1>}, {pipeline_mode = #tpu.pipeline_mode<synchronous>, transform_indices = @transform_3, window_bounds = array<i64: 1, 1>}]} {
    %c0_i32 = arith.constant 0 : i32
    %0 = arith.cmpi eq, %arg0, %c0_i32 : i32
    %1 = arith.extui %0 : i1 to i32
    %c0_i32_0 = arith.constant 0 : i32
    %2 = arith.cmpi ne, %1, %c0_i32_0 : i32
    scf.if %2 {
      %cst_13 = arith.constant 0.000000e+00 : f32
      %21 = vector.broadcast %cst_13 : f32 to vector<8x128xf32>
      %c0_14 = arith.constant 0 : index
      %c0_15 = arith.constant 0 : index
      %22 = vector.load %arg5[%c0_14, %c0_15] : memref<8x128xf32, #tpu.memory_space<vmem>>, vector<8x128xf32>
      tpu.vector_store %arg5[%c0_14, %c0_15], %21 {strides = array<i32>} : memref<8x128xf32, #tpu.memory_space<vmem>>, vector<8x128xf32>,
      %cst_16 = arith.constant 0.000000e+00 : f32
      %23 = vector.broadcast %cst_16 : f32 to vector<1x1xf32>
      %c0_17 = arith.constant 0 : index
      %c0_18 = arith.constant 0 : index
      %24 = vector.load %arg4[%c0_17, %c0_18] : memref<1x1xf32, #tpu.memory_space<vmem>>, vector<1x1xf32>
      tpu.vector_store %arg4[%c0_17, %c0_18], %23 {strides = array<i32>} : memref<1x1xf32, #tpu.memory_space<vmem>>, vector<1x1xf32>,
    } else {
    }
    %c0 = arith.constant 0 : index
    %c0_1 = arith.constant 0 : index
    %3 = vector.load %arg1[%c0, %c0_1] : memref<8x128xf32, #tpu.memory_space<vmem>>, vector<8x128xf32>
    %c0_2 = arith.constant 0 : index
    %c0_3 = arith.constant 0 : index
    %4 = vector.load %arg2[%c0_2, %c0_3] : memref<8x128xf32, #tpu.memory_space<vmem>>, vector<8x128xf32>
    %c0_4 = arith.constant 0 : index
    %c0_5 = arith.constant 0 : index
    %5 = vector.load %arg3[%c0_4, %c0_5] : memref<8x1xf32, #tpu.memory_space<vmem>>, vector<8x1xf32>
    %c0_6 = arith.constant 0 : index
    %c0_7 = arith.constant 0 : index
    %6 = vector.load %arg5[%c0_6, %c0_7] : memref<8x128xf32, #tpu.memory_space<vmem>>, vector<8x128xf32>
    %cst = arith.constant 1.000000e+00 : f32
    %7 = vector.broadcast %cst : f32 to vector<8x128xf32>
    %8 = arith.subf %4, %7 : vector<8x128xf32>
    %cst_8 = arith.constant 1.000000e+00 : f32
    %9 = vector.broadcast %cst_8 : f32 to vector<8x128xf32>
    %10 = arith.subf %4, %9 : vector<8x128xf32>
    %11 = arith.mulf %8, %10 : vector<8x128xf32>
    %12 = arith.mulf %3, %3 : vector<8x128xf32>
    %13 = arith.addf %11, %12 : vector<8x128xf32>
    %14 = vector.broadcast %5 : vector<8x1xf32> to vector<8x128xf32>
    %15 = arith.mulf %14, %13 : vector<8x128xf32>
    %16 = arith.addf %6, %15 : vector<8x128xf32>
    %c0_9 = arith.constant 0 : index
    %c0_10 = arith.constant 0 : index
    %17 = vector.load %arg5[%c0_9, %c0_10] : memref<8x128xf32, #tpu.memory_space<vmem>>, vector<8x128xf32>
    tpu.vector_store %arg5[%c0_9, %c0_10], %16 {strides = array<i32>} : memref<8x128xf32, #tpu.memory_space<vmem>>, vector<8x128xf32>,
    %c0_i32_11 = arith.constant 0 : i32
    %18 = arith.cmpi eq, %arg0, %c0_i32_11 : i32
    %19 = arith.extui %18 : i1 to i32
    %c0_i32_12 = arith.constant 0 : i32
    %20 = arith.cmpi ne, %19, %c0_i32_12 : i32
    scf.if %20 {
      %c0_13 = arith.constant 0 : index
      %c0_14 = arith.constant 0 : index
      %21 = vector.load %arg4[%c0_13, %c0_14] : memref<1x1xf32, #tpu.memory_space<vmem>>, vector<1x1xf32>
      %c0_15 = arith.constant 0 : index
      %c0_16 = arith.constant 0 : index
      %22 = vector.load %arg5[%c0_15, %c0_16] : memref<8x128xf32, #tpu.memory_space<vmem>>, vector<8x128xf32>
      %23 = vector.shape_cast %22 : vector<8x128xf32> to vector<1x8x128xf32>
      %cst_17 = arith.constant dense<0.000000e+00> : vector<1xf32>
      %24 = vector.multi_reduction <add>, %23, %cst_17 [1, 2] : vector<1x8x128xf32> to vector<1xf32>
      %25 = vector.shape_cast %24 : vector<1xf32> to vector<1x1x1xf32>
      %26 = vector.extract %25[0, 0, 0] : f32 from vector<1x1x1xf32>
      %27 = vector.broadcast %26 : f32 to vector<1x1xf32>
      %28 = arith.addf %21, %27 : vector<1x1xf32>
      %c0_18 = arith.constant 0 : index
      %c0_19 = arith.constant 0 : index
      %29 = vector.load %arg4[%c0_18, %c0_19] : memref<1x1xf32, #tpu.memory_space<vmem>>, vector<1x1xf32>
      tpu.vector_store %arg4[%c0_18, %c0_19], %28 {strides = array<i32>} : memref<1x1xf32, #tpu.memory_space<vmem>>, vector<1x1xf32>,
    } else {
    }
    return
  }
  func.func @transform_0(%arg0: i32) -> (i32, i32) {
    %c0_i32 = arith.constant 0 : i32
    %c0_i32_0 = arith.constant 0 : i32
    return %arg0, %c0_i32 : i32, i32
  }
  func.func @transform_1(%arg0: i32) -> (i32, i32) {
    %c0_i32 = arith.constant 0 : i32
    %c0_i32_0 = arith.constant 0 : i32
    return %arg0, %c0_i32 : i32, i32
  }
  func.func @transform_2(%arg0: i32) -> (i32, i32) {
    %c0_i32 = arith.constant 0 : i32
    %c0_i32_0 = arith.constant 0 : i32
    return %arg0, %c0_i32 : i32, i32
  }
  func.func @transform_3(%arg0: i32) -> (i32, i32) {
    %c0_i32 = arith.constant 0 : i32
    %c0_i32_0 = arith.constant 0 : i32
    %c0_i32_1 = arith.constant 0 : i32
    return %c0_i32, %c0_i32_0 : i32, i32
  }
}

</mosaic_0001>

<bundles_post_ra>
// kernel: tpu_custom_call.1
= control target key start
LH: loop header
LB: loop body
LE: loop exit
PB: predicated region body
PF: predicated region fallthrough
CT: control target
= control target key end

     0   :  { %8 = vsyncpa [#allocation4], 0  ;;  %s195_s0 = inlined_call_operand.vmem [shape: f32[8,128], index: 0, kind: input, shape index: {}]   ;;  %s196_s1 = inlined_call_operand.hbm [shape: f32[8,128], index: 1, kind: input, shape index: {}]   ;;  %s197_s2 = inlined_call_operand.vmem [shape: f32[8,1], index: 2, kind: input, shape index: {}]   ;;  %s198_s3 = inlined_call_operand.hbm [shape: f32[1,1], index: 3, kind: output, shape index: {}]  }
   0x1   :  { %9 = vsyncpa [#allocation5], 0  ;;  %s139_s12 = smov [#allocation3]   ;;  %s91_s16 = scalar_lea.hbm %s196_s1, 128 }
   0x2   :  { %s18_s13 = sshll.u32 %s139_s12, 4  ;;  %p92_p0 = scmp.ne.s32.totalorder %s196_s1, %s91_s16  ;;  %s19_s13 = int_to_ptr.vmem [resolvable:$true] %s18_s13 }
   0x3   :  { %p95_p1 = scmp.lt.u32.totalorder %s91_s16, %s196_s1 }
   0x5   :  { %p97_p2 = pnand %p95_p1, %p92_p0 }
   0x7   :  { %100 = shalt.err (!%p97_p2)
}
   0x8   :  { %s101_s21 = scalar_lea.vmem %s19_s13, 128  ;;  %p106_p4 = scmp.lt.s32.totalorder %s19_s13, %s19_s13 }
   0x9   :  { %p102_p3 = scmp.ne.s32.totalorder %s19_s13, %s101_s21  ;;  %p107_p5 = scmp.lt.s32.totalorder %s101_s21, %s101_s21 }
   0xb   :  { %p108_p6 = por %p107_p5, %p106_p4 }
   0xd   :  { %p109_p7 = pnand %p108_p6, %p102_p3 }
   0xf   :  { %112 = shalt.err (!%p109_p7)
}
  0x10   :  { %21 = dma.hbm_to_vmem [thread:$0]  %s196_s1, 128, %s19_s13, [#allocation4]  }
  0x11   :  { %135 = dma.done.wait [#allocation4], 128  }
  0x12   :  { %136 = vsyncadd [#allocation4], 4294967168  ;;  %vm32_vm0 = vcmask 0   ;;  %v140_v0 = vmov 0.0   ;;  %v141_v1 = vmov 0   ;;  %v36_v2 = vld [vmem:[%s197_s2] sm:$0xff] }
  0x13   :  { %33 = vst.msk [vmem:[#allocation6] sm:$0x1] %vm32_vm0, %v140_v0  ;;  %90 = vset.pattern.permute.xlu0 %v141_v1  ;;  %v35_v3 = vld [vmem:[#allocation3] sm:$0xff]  ;;  %s142_s1 = smov [#allocation6]  }
  0x14   :  { %44 = vperm.xlu0 %90, %v36_v2   ;;  %v83_v4 = vadd.f32 -1.0, %v35_v3  ;;  %v34_v5 = vld [vmem:[%s195_s0] sm:$0xff]  ;;  %s74_s2 = sshll.u32 %s142_s1, 4  ;;  %s75_s2 = int_to_ptr.vmem [resolvable:$true] %s74_s2 }
  0x15   :  { %v40_v7 = vmul.f32 %v34_v5, %v34_v5  ;;  %s113_s0 = scalar_lea.vmem %s75_s2, 16  ;;  %s117_s29 = scalar_lea.vmem %s75_s2, 32 }
  0x16   :  { %v39_v6 = vmul.f32 %v83_v4, %v83_v4  ;;  %p114_p8 = scmp.ne.s32.totalorder %s75_s2, %s113_s0  ;;  %p118_p9 = scmp.lt.s32.totalorder %s75_s2, %s75_s2 }
  0x17   :  { %p119_p10 = scmp.lt.s32.totalorder %s117_s29, %s113_s0 }
  0x18   :  { %v41_v8 = vadd.f32 %v40_v7, %v39_v6 }
  0x19   :  { %p120_p11 = por %p119_p10, %p118_p9 }
  0x1a   :  { %v53_v18 = vld [vmem:[#allocation6] sm:$0x1] }
  0x1b   :  { %p121_p12 = pnand %p120_p11, %p114_p8 }
  0x93   :  { %v45_v9 = vpop.permute.xlu0 %44 }
  0x94   :  { %v47_v10 = vmul.f32 %v45_v9, %v41_v8 }
  0x96   :  { %55 = vadd.xlane.f32.xlu0 %v47_v10 }
 0x123   :  { %v56_v11 = vpop.xlane.xlu0 %55 }
 0x124   :  { %v57_v12 = vrot.slane %v56_v11, 4 }
 0x126   :  { %v58_v13 = vadd.f32 %v57_v12, %v56_v11 }
 0x128   :  { %v59_v14 = vrot.slane %v58_v13, 2 }
 0x12a   :  { %v60_v15 = vadd.f32 %v59_v14, %v58_v13 }
 0x12c   :  { %v61_v16 = vrot.slane %v60_v15, 1 }
 0x12e   :  { %v62_v17 = vadd.f32 %v61_v16, %v60_v15 }
 0x130   :  { %84 = vpush %v62_v17 }
 0x161   :  { %s85_s28 = spop %84 }
 0x162   :  { %v64_v19 = vstv %s85_s28 }
 0x163   :  { %v65_v20 = vadd.f32 %v64_v19, %v53_v18 }
 0x165   :  { %67 = vst.msk [vmem:[#allocation6] sm:$0x1] %vm32_vm0, %v65_v20 }
 0x166   :  { %124 = shalt.err (!%p121_p12)
}
 0x167   :  { %s125_s5 = scalar_lea.hbm %s198_s3, 16 }
 0x168   :  { %p126_p13 = scmp.ne.s32.totalorder %s198_s3, %s125_s5  ;;  %p129_p0 = scmp.lt.u32.totalorder %s125_s5, %s198_s3 }
 0x16a   :  { %p131_p1 = pnand %p129_p0, %p126_p13 }
 0x16c   :  { %134 = shalt.err (!%p131_p1)
}
 0x16d   :  { %77 = dma.vmem_to_hbm [thread:$0]  %s75_s2, 16, %s198_s3, [#allocation5]  }
 0x16e   :  { %137 = dma.done.wait [#allocation5], 16  }
 0x16f   :  { %138 = vsyncadd [#allocation5], 4294967280 }
 0x170   :  { %81 = vsyncpa [#allocation4], 1 }
 0x171   :  { %82 = vsyncpa [#allocation5], 1 }

</bundles_post_ra>
